<compile_context>
chip_gen: v5e
topology: v5e:2x2
jax: 0.10.0
libtpu: 0.0.40
codegen_flags: <defaults>
</compile_context>

<pallas_src>
import jax
import jax.numpy as jnp
from jax.experimental import pallas as pl
from jax.experimental.pallas import tpu as pltpu


def rope_kernel(pos_ref, theta_ref, x_ref, o_ref):
    # pos_ref:   (TS, 1)    int32  positions for this (batch, seq-tile)
    # theta_ref: (1, D//2)  f32    unique half of the inverse-frequency vector
    # x_ref:     (H, TS, D) input tile: all heads of one (batch, seq-tile)
    # o_ref:     (H, TS, D) output tile (same dtype as input)
    half = theta_ref.shape[-1]

    # cos/sin tables: computed once per (batch, seq-tile), broadcast over heads.
    pos = pos_ref[...].astype(jnp.float32)               # (TS, 1)
    angles = pos * theta_ref[...]                         # (TS, half) outer product
    c = jnp.cos(angles)[None, :, :]                        # (1, TS, half)
    s = jnp.sin(angles)[None, :, :]                        # (1, TS, half)

    x = x_ref[...].astype(jnp.float32)                     # (H, TS, D)
    x1 = x[..., :half]
    x2 = x[..., half:]
    # rotate_half via direct half-computation (sign folded into the subtract):
    #   out[..., :half] = x1*cos - x2*sin
    #   out[..., half:] = x2*cos + x1*sin
    out = jnp.concatenate([x1 * c - x2 * s, x2 * c + x1 * s], axis=-1)
    o_ref[...] = out.astype(o_ref.dtype)                   # one lane-dense full-D store


def mistral_rotary_embedding(hidden_states, position_ids, theta, *, seq_tile=256):
    """Apply rotary embedding.

    hidden_states: (B, H, S, D) any float dtype (bf16/f32); output has the same dtype.
    position_ids:  (B, S) integer.
    theta:         (D,) duplicated inverse frequencies (theta[d] == theta[d + D//2]),
                   exactly as constructed by MistralRotaryEmbedding.__init__.
    """
    B, H, S, D = hidden_states.shape
    assert D % 2 == 0
    half = D // 2

    # theta is duplicated by module construction; only the unique half is needed.
    theta_half = theta[:half].astype(jnp.float32).reshape(1, half)
    # Keep positions as int32; the f32 cast happens in-kernel (exact < 2^24).
    pos = position_ids.astype(jnp.int32).reshape(B, S, 1)

    # Sequence tile: big enough that one (H, TS, D) slab is a multi-MiB DMA,
    # small enough that double-buffered in+out stays well under scoped VMEM on
    # all of v5e / v6e / v7x (H=32, TS=256, D=128 bf16 -> 2 MiB block, ~8 MiB live).
    ts = S if S <= seq_tile else seq_tile   # when < S it must be a multiple of 8

    grid = (B, pl.cdiv(S, ts))

    return pl.pallas_call(
        rope_kernel,
        out_shape=jax.ShapeDtypeStruct((B, H, S, D), hidden_states.dtype),
        grid_spec=pltpu.PrefetchScalarGridSpec(
            num_scalar_prefetch=0,
            grid=grid,
            in_specs=[
                # positions: (TS, 1) int32 tile per (b, s-tile)
                pl.BlockSpec((None, ts, 1), lambda b, s: (b, s, 0)),
                # theta half: constant index map -> stays VMEM-resident
                pl.BlockSpec((1, half), lambda b, s: (0, 0)),
                # hidden states: one (H, TS, D) slab per (b, s-tile)
                pl.BlockSpec((None, H, ts, D), lambda b, s: (b, 0, s, 0)),
            ],
            out_specs=pl.BlockSpec((None, H, ts, D), lambda b, s: (b, 0, s, 0)),
        ),
        compiler_params=pltpu.CompilerParams(
            dimension_semantics=("parallel", "parallel")),
    )(pos, theta_half, hidden_states)


def make_theta(head_size: int, base: int = 10000) -> jnp.ndarray:
    """Deterministic parameter init matching the PyTorch __init__."""
    half = jnp.arange(0, head_size, 2, dtype=jnp.float32) / head_size
    theta_half = 1.0 / (base ** half)                          # (head_size//2,)
    return jnp.concatenate([theta_half, theta_half], axis=-1)  # (head_size,)


def reference(hidden_states, position_ids, theta):
    # plain-JAX reference of the PyTorch forward (for validation)
    angles = position_ids.astype(jnp.float32)[..., None] * theta[None, None, :]
    cos = jnp.cos(angles)[:, None, :, :]
    sin = jnp.sin(angles)[:, None, :, :]
    half = hidden_states.shape[-1] // 2
    x1 = hidden_states[..., :half]
    x2 = hidden_states[..., half:]
    rot = jnp.concatenate([-x2, x1], axis=-1)
    return hidden_states * cos + rot * sin


if __name__ == "__main__":
    head_size = 32
    max_position_embeddings = 2048
    base = 10000
    B, H, S, D = 2, 4, 8, head_size

    theta = make_theta(head_size, base)

    key = jax.random.PRNGKey(0)
    k1, k2 = jax.random.split(key)
    x_f32 = jax.random.normal(k1, (B, H, S, D), dtype=jnp.float32)
    position_ids = jax.random.randint(
        k2, (B, S), 0, max_position_embeddings, dtype=jnp.int32)

    # float32 path: tight numerical check
    out_f32 = jax.block_until_ready(
        mistral_rotary_embedding(x_f32, position_ids, theta))
    ref_f32 = reference(x_f32, position_ids, theta)
    assert out_f32.shape == (B, H, S, D)
    assert out_f32.dtype == jnp.float32
    assert jnp.allclose(out_f32, ref_f32, atol=1e-4, rtol=1e-4)

    # bfloat16 path (production dtype): bf16 HBM I/O, f32 math inside the kernel
    x_bf16 = x_f32.astype(jnp.bfloat16)
    out_bf16 = jax.block_until_ready(
        mistral_rotary_embedding(x_bf16, position_ids, theta))
    ref_bf16 = reference(x_bf16.astype(jnp.float32), position_ids, theta)
    assert out_bf16.dtype == jnp.bfloat16
    assert jnp.allclose(out_bf16.astype(jnp.float32), ref_bf16,
                        atol=3e-2, rtol=3e-2)

    print("KERNEL_OK")
</pallas_src>

<mosaic_0001>
module attributes {stable_mosaic.version = 11 : i64} {
  func.func @rope_kernel(%arg0: i32, %arg1: i32, %arg2: memref<1x8x1xi32, #tpu.memory_space<vmem>>, %arg3: memref<1x16xf32, #tpu.memory_space<vmem>>, %arg4: memref<1x4x8x32xf32, #tpu.memory_space<vmem>>, %arg5: memref<1x4x8x32xf32, #tpu.memory_space<vmem>>) attributes {dimension_semantics = [#tpu.dimension_semantics<parallel>, #tpu.dimension_semantics<parallel>], iteration_bounds = array<i64: 2, 1>, scalar_prefetch = 0 : i64, scratch_operands = 0 : i64, tpu.core_type = #tpu.core_type<tc>, window_params = [{transform_indices = @transform_0, window_bounds = array<i64: 1, 8, 1>}, {pipeline_mode = #tpu.pipeline_mode<synchronous>, transform_indices = @transform_1, window_bounds = array<i64: 1, 16>}, {transform_indices = @transform_2, window_bounds = array<i64: 1, 4, 8, 32>}, {transform_indices = @transform_3, window_bounds = array<i64: 1, 4, 8, 32>}]} {
    %c0 = arith.constant 0 : index
    %c0_0 = arith.constant 0 : index
    %c0_1 = arith.constant 0 : index
    %0 = vector.load %arg2[%c0, %c0_0, %c0_1] : memref<1x8x1xi32, #tpu.memory_space<vmem>>, vector<1x8x1xi32>
    %1 = vector.shape_cast %0 : vector<1x8x1xi32> to vector<8x1xi32>
    %2 = arith.sitofp %1 : vector<8x1xi32> to vector<8x1xf32>
    %c0_2 = arith.constant 0 : index
    %c0_3 = arith.constant 0 : index
    %3 = vector.load %arg3[%c0_2, %c0_3] : memref<1x16xf32, #tpu.memory_space<vmem>>, vector<1x16xf32>
    %4 = vector.broadcast %2 : vector<8x1xf32> to vector<8x16xf32>
    %5 = vector.broadcast %3 : vector<1x16xf32> to vector<8x16xf32>
    %6 = arith.mulf %4, %5 : vector<8x16xf32>
    %7 = math.cos %6 : vector<8x16xf32>
    %8 = vector.shape_cast %7 : vector<8x16xf32> to vector<1x8x16xf32>
    %9 = math.sin %6 : vector<8x16xf32>
    %10 = vector.shape_cast %9 : vector<8x16xf32> to vector<1x8x16xf32>
    %c0_4 = arith.constant 0 : index
    %c0_5 = arith.constant 0 : index
    %c0_6 = arith.constant 0 : index
    %c0_7 = arith.constant 0 : index
    %11 = vector.load %arg4[%c0_4, %c0_5, %c0_6, %c0_7] : memref<1x4x8x32xf32, #tpu.memory_space<vmem>>, vector<1x4x8x32xf32>
    %12 = vector.shape_cast %11 : vector<1x4x8x32xf32> to vector<4x8x32xf32>
    %13 = vector.extract_strided_slice %12 {offsets = [0, 0, 0], sizes = [4, 8, 16], strides = [1, 1, 1]} : vector<4x8x32xf32> to vector<4x8x16xf32>
    %14 = vector.extract_strided_slice %12 {offsets = [0, 0, 16], sizes = [4, 8, 16], strides = [1, 1, 1]} : vector<4x8x32xf32> to vector<4x8x16xf32>
    %15 = vector.broadcast %8 : vector<1x8x16xf32> to vector<4x8x16xf32>
    %16 = arith.mulf %13, %15 : vector<4x8x16xf32>
    %17 = vector.broadcast %10 : vector<1x8x16xf32> to vector<4x8x16xf32>
    %18 = arith.mulf %14, %17 : vector<4x8x16xf32>
    %19 = arith.subf %16, %18 : vector<4x8x16xf32>
    %20 = vector.broadcast %8 : vector<1x8x16xf32> to vector<4x8x16xf32>
    %21 = arith.mulf %14, %20 : vector<4x8x16xf32>
    %22 = vector.broadcast %10 : vector<1x8x16xf32> to vector<4x8x16xf32>
    %23 = arith.mulf %13, %22 : vector<4x8x16xf32>
    %24 = arith.addf %21, %23 : vector<4x8x16xf32>
    %25 = tpu.concatenate %19, %24 in 2 : vector<4x8x16xf32>, vector<4x8x16xf32> -> vector<4x8x32xf32>
    %c0_8 = arith.constant 0 : index
    %c0_9 = arith.constant 0 : index
    %c0_10 = arith.constant 0 : index
    %c0_11 = arith.constant 0 : index
    %26 = vector.load %arg5[%c0_8, %c0_9, %c0_10, %c0_11] : memref<1x4x8x32xf32, #tpu.memory_space<vmem>>, vector<1x4x8x32xf32>
    %27 = vector.shape_cast %26 : vector<1x4x8x32xf32> to vector<4x8x32xf32>
    %28 = vector.shape_cast %25 : vector<4x8x32xf32> to vector<1x4x8x32xf32>
    tpu.vector_store %arg5[%c0_8, %c0_9, %c0_10, %c0_11], %28 {strides = array<i32>} : memref<1x4x8x32xf32, #tpu.memory_space<vmem>>, vector<1x4x8x32xf32>,
    return
  }
  func.func @transform_0(%arg0: i32, %arg1: i32) -> (i32, i32, i32) {
    %c0_i32 = arith.constant 0 : i32
    %c0_i32_0 = arith.constant 0 : i32
    return %arg0, %arg1, %c0_i32 : i32, i32, i32
  }
  func.func @transform_1(%arg0: i32, %arg1: i32) -> (i32, i32) {
    %c0_i32 = arith.constant 0 : i32
    %c0_i32_0 = arith.constant 0 : i32
    %c0_i32_1 = arith.constant 0 : i32
    return %c0_i32, %c0_i32_0 : i32, i32
  }
  func.func @transform_2(%arg0: i32, %arg1: i32) -> (i32, i32, i32, i32) {
    %c0_i32 = arith.constant 0 : i32
    %c0_i32_0 = arith.constant 0 : i32
    %c0_i32_1 = arith.constant 0 : i32
    return %arg0, %c0_i32, %arg1, %c0_i32_0 : i32, i32, i32, i32
  }
  func.func @transform_3(%arg0: i32, %arg1: i32) -> (i32, i32, i32, i32) {
    %c0_i32 = arith.constant 0 : i32
    %c0_i32_0 = arith.constant 0 : i32
    %c0_i32_1 = arith.constant 0 : i32
    return %arg0, %c0_i32, %arg1, %c0_i32_0 : i32, i32, i32, i32
  }
}

</mosaic_0001>

<bundles_post_ra>
// kernel: tpu_custom_call.1
= control target key start
LH: loop header
LB: loop body
LE: loop exit
PB: predicated region body
PF: predicated region fallthrough
CT: control target
= control target key end

     0   :  { %8 = vsyncpa [#allocation3], 0  ;;  %s1210_s0 = inlined_call_operand.vmem [shape: s32[2,8,1], index: 0, kind: input, shape index: {}]   ;;  %s1211_s1 = inlined_call_operand.vmem [shape: f32[1,16], index: 1, kind: input, shape index: {}]   ;;  %s1212_s2 = inlined_call_operand.hbm [shape: f32[2,4,8,32], index: 2, kind: input, shape index: {}]   ;;  %s1213_s3 = inlined_call_operand.hbm [shape: f32[2,4,8,32], index: 3, kind: output, shape index: {}]  }
   0x1   :  { %10 = vsyncpa [#allocation3 + $0x1], 0 }
   0x2   :  { %11 = vsyncpa [#allocation4], 0 }
   0x3   :  { %13 = vsyncpa [#allocation4 + $0x1], 0  ;;  %s1000_s12 = smov 0   ;;  %s1002_s13 = smov 0  }
   0x4   :  { %s1004_s14 = smov 0   ;;  %s1006_s15 = smov 0  }
   0x5   :  { %s1008_s16 = smov 0   ;;  %s1010_s17 = smov 0  }
   0x6 LB: > { %s752_s18 = sadd.s32 4294967295, %s965_s17   ;;  %s753_s19 = sadd.s32 4294967294, %s965_s17   ;;  %s965_s17 = sphi %s1010_s17, %s19_s17   ;;  %s961_s16 = sphi %s1008_s16, %s1222_s16   ;;  %s957_s15 = sphi %s1006_s15, %s1221_s15   ;;  %s953_s14 = sphi %s1004_s14, %s1220_s14   ;;  %s949_s13 = sphi %s1002_s13, %s1219_s13   ;;  %s945_s12 = sphi %s1000_s12, %s1218_s12  }
   0x7   : > { %s31_s20 = sadd.s32 1, %s961_s16  ;;  %s89_s21 = sadd.s32 1, %s953_s14 }
   0x8   : > { %p33_p0 = scmp.ge.s32.totalorder %s31_s20, 2  ;;  %p96_p1 = scmp.ne.s32.totalorder %s953_s14, %s949_s13 }
   0x9   : > { %p97_p2 = scmp.eq.s32.totalorder %s965_s17, 0  ;;  %p102_p3 = scmp.ne.s32.totalorder %s949_s13, %s945_s12 }
   0xa   : > { %s1224_s20 = smov (%p33_p0, %s31_s20), 0  ;;  %p103_p5 = scmp.eq.s32.totalorder %s752_s18, 0 }
   0xb   : > { %p1041_p4 = por %p97_p2, %p96_p1  ;;  %s84_s23 = ssub.s32 %s961_s16, %s1224_s20 }
   0xc   : > { %p128_p6 = scmp.eq.s32.totalorder %s752_s18, 1  ;;  %p87_p7 = scmp.eq.s32.totalorder %s84_s23, 0 }
   0xd   : > { %p1047_p8 = por %p103_p5, %p102_p3  ;;  %p134_p10 = scmp.eq.s32.totalorder %s753_s19, 1 }
   0xe   : > { %p1051_p9 = por %p128_p6, %p96_p1  ;;  %p755_p12 = scmp.ge.s32.totalorder %s965_s17, 2 }
   0xf   : > { %s1056_s26 = scalar_select %p87_p7, %s953_s14, %s89_s21  }
  0x10   : > { %p1058_p11 = por %p134_p10, %p102_p3  ;;  %p788_p13 = scmp.lt.s32.totalorder %s965_s17, 2 }
  0x11   : > { %s167_s28 = sand.u32 1, %s953_s14   ;;  %s774_s30 = sshll.u32 %s961_s16, 5 }
  0x12   : > { %s756_s29 = sshll.u32 %s167_s28, 5  ;;  %s177_s6 = scalar_lea.hbm %s1212_s2, %s774_s30 }
  0x13   : > { %s171_s7 = scalar_lea.vmem [#allocation2], %s756_s29  ;;  %s178_s9 = sshll.u32 %s177_s6, 4  ;;  %s179_s9 = int_to_ptr.hbm [resolvable:$true] %s178_s9 }
  0x14   : > { %s180_s8 = sshll.u32 %s171_s7, 4  ;;  %p781_p0 = pnand %p788_p13, %p1041_p4  ;;  %s181_s8 = int_to_ptr.vmem [resolvable:$true] %s180_s8 }
  0x15   : > { %p759_p1 = scmp.ge.s32.totalorder %s965_s17, 1  ;;  %s168_s10 = scalar_lea.sflag [#allocation3], %s167_s28 }
  0x16   : > { %s967_s11 = smov 128   ;;  %s968_s18 = smov 8  }
  0x17   : > { %783 = dma.hbm_to_vmem [thread:$0]  (!%p781_p0), %s179_s9, 512, %s181_s8, %s168_s10, %s967_s11, %s967_s11, %s968_s18  }
  0x18   : > { %p188_p2 = scmp.lt.s32.totalorder %s965_s17, 3 }
  0x1a   : > { %p189_p3 = pnand %p759_p1, %p188_p2 }
  0x1b   : > { %s1074_s19 = sand.u32 (!%p189_p3), 1, %s949_s13  }
  0x1c   : > { %192 = sbr.rel (%p189_p3) target bundleno = 504 (0x1f8), region = 32  ;;  %s760_s21 = sshll.u32 (!%p189_p3), %s1074_s19, 5 }
  0x1d   : > { %s195_s23 = scalar_lea.sflag (!%p189_p3), [#allocation3], %s1074_s19  ;;  %s1080_s22 = scalar_lea.vmem (!%p189_p3), [#allocation2], %s760_s21 }
  0x21   : > { %936 = dma.done.wait (%p1047_p8), %s195_s23, 512  }
  0x22   : > { %938 = vsyncadd (%p1047_p8), %s195_s23, 4294966784  ;;  %p229_p4 = scmp.lt.s32.totalorder %s957_s15, 1  ;;  %v969_v0 = vmov 0   ;;  %v852_v3 = vld [vmem:[%s1211_s1] ss:$0 sm:$0xff]  ;;  %s976_s24 = smov 16  }
  0x23   : > { %851 = vset.pattern.permute.xlu0 %v969_v0  ;;  %v970_v17 = vmov 683565275   ;;  %v971_v19 = vmov 2475754826   ;;  %v972_v22 = vmov 2131351028  }
  0x24   : > { %s230_s28 = scalar_select %p229_p4, %s957_s15, 1  ;;  %v973_v25 = vmov 2102212464   ;;  %v974_v28 = vmov 920167782  }
  0x25   : > { %v975_v31 = vmov 1326507024   ;;  %s977_s8 = smov 112   ;;  %s228_s9 = scalar_lea.vmem [#allocation5], %s760_s21 }
  0x26   : > { %s762_s29 = sshll.u32 %s230_s28, 3  ;;  %s775_s10 = sshll.u32 %s957_s15, 5 }
  0x27   : > { %s235_s5 = scalar_lea.vmem %s1210_s0, %s762_s29  ;;  %s648_s23 = scalar_lea.hbm %s1213_s3, %s775_s10 }
  0x28   : > { %v236_v1 = vld [vmem:[%s235_s5] sm:$0xff]  ;;  %s651_s21 = sshll.u32 %s648_s23, 4  ;;  %s636_s15 = scalar_lea.sflag [#allocation4], %s1074_s19  ;;  %s652_s21 = int_to_ptr.hbm [resolvable:$true] %s651_s21 }
  0x29   : > { %v237_v2 = vcvt.s32.f32 %v236_v1  ;;  %s897_s28 = sshra.s32 %s652_s21, 4  ;;  %s903_s5 = scalar_lea.hbm %s1213_s3, 64  ;;  %s898_s28 = int_to_ptr.hbm [resolvable:$true] %s897_s28 }
  0x2a   : > { %s899_s29 = scalar_lea.hbm %s898_s28, 32  ;;  %p904_p8 = scmp.lt.s32.totalorder %s898_s28, %s1213_s3 }
  0x2b   : > { %241 = vperm.xlu0 %851, %v237_v2   ;;  %p900_p5 = scmp.ne.s32.totalorder %s898_s28, %s899_s29  ;;  %p905_p10 = scmp.lt.s32.totalorder %s903_s5, %s899_s29 }
  0x2d   : > { %p901_p6 = pnand %p900_p5, %p1051_p9  ;;  %p906_p13 = por %p905_p10, %p904_p8 }
  0x2f   : > { %p902_p7 = pneg %p901_p6 }
  0x31   : > { %p907_p0 = pnand %p906_p13, %p902_p7 }
  0x9d   : > { %v242_v4 = vpop.permute.xlu0 %241 }
  0x9e   : > { %v1095_v5 = vmul.f32 %v852_v3, %v242_v4 }
  0xa0   : > { %v251_v6 = vand.u32 2139095040, %v1095_v5  ;;  %v248_v9 = vand.u32 2147483647, %v1095_v5  ;;  %vm250_vm12 = vcmp.lt.s32.totalorder %v1095_v5, 0 }
  0xa2   : > { %v252_v7 = vshrl.u32 %v251_v6, 23  ;;  %v255_v11 = vand.u32 8388607, %v248_v9  ;;  %vm249_vm13 = vcmp.le.f32.partialorder %v248_v9, 0.7853982 }
  0xa4   : > { %v763_v8 = vadd.s32 4294967169, %v252_v7  ;;  %v256_v15 = vor.u32 8388608, %v255_v11 }
  0xa6   : > { %v258_v10 = vadd.s32 1, %v763_v8  ;;  %v1112_v38 = vshll.u32 %v256_v15, 8 }
  0xa8   : > { %vm259_vm0 = vcmp.gt.s32.totalorder %v258_v10, 0  ;;  %v297_v47 = vand.u32 65535, %v1112_v38  ;;  %v298_v48 = vshrl.u32 %v1112_v38, 16 }
  0xa9   : > { %v260_v12 = vsel %vm259_vm0, %v258_v10, 0 }
  0xaa   : > { %v262_v13 = vand.u32 31, %v260_v12  ;;  %v1103_v16 = vshrl.u32 %v260_v12, 5 }
  0xac   : > { %v1101_v14 = vsub.s32 32, %v262_v13  ;;  %v265_v18 = vshll.u32 %v970_v17, %v262_v13  ;;  %v268_v20 = vshll.u32 %v971_v19, %v262_v13  ;;  %v271_v24 = vshll.u32 %v972_v22, %v262_v13 }
  0xad   : > { %v274_v27 = vshll.u32 %v973_v25, %v262_v13  ;;  %v277_v30 = vshll.u32 %v974_v28, %v262_v13  ;;  %vm280_vm1 = vcmp.lt.s32.totalorder %v1103_v16, 1  ;;  %vm283_vm2 = vcmp.lt.s32.totalorder %v1103_v16, 4 }
  0xae   : > { %v266_v21 = vshrl.u32 %v971_v19, %v1101_v14  ;;  %v269_v23 = vshrl.u32 %v972_v22, %v1101_v14  ;;  %v272_v26 = vshrl.u32 %v973_v25, %v1101_v14  ;;  %v275_v29 = vshrl.u32 %v974_v28, %v1101_v14 }
  0xaf   : > { %v278_v32 = vshrl.u32 %v975_v31, %v1101_v14  ;;  %vm282_vm3 = vcmp.lt.s32.totalorder %v1103_v16, 3  ;;  %vm281_vm4 = vcmp.lt.s32.totalorder %v1103_v16, 2  ;;  %v264_v12 = vshrl.u32 %v970_v17, %v1101_v14 }
  0xb0   : > { %v267_v33 = vor.u32 %v266_v21, %v265_v18  ;;  %v270_v34 = vor.u32 %v269_v23, %v268_v20  ;;  %v273_v35 = vor.u32 %v272_v26, %v271_v24  ;;  %v276_v36 = vor.u32 %v275_v29, %v274_v27 }
  0xb1   : > { %v279_v37 = vor.u32 %v278_v32, %v277_v30 }
  0xb2   : > { %v288_v39 = vsel %vm280_vm1, %v267_v33, %v270_v34  ;;  %v292_v40 = vsel %vm280_vm1, %v270_v34, %v273_v35  ;;  %v289_v41 = vsel %vm283_vm2, %v276_v36, 920167782  ;;  %v285_v8 = vsel %vm283_vm2, %v273_v35, 2102212464 }
  0xb3   : > { %v293_v42 = vsel %vm283_vm2, %v279_v37, 1326507024  ;;  %v290_v43 = vsel %vm282_vm3, %v273_v35, %v289_v41  ;;  %v284_v21 = vsel %vm280_vm1, %v264_v12, %v267_v33  ;;  %v286_v22 = vsel %vm282_vm3, %v270_v34, %v285_v8 }
  0xb4   : > { %v294_v44 = vsel %vm282_vm3, %v276_v36, %v293_v42  ;;  %v291_v45 = vsel %vm281_vm4, %v288_v39, %v290_v43  ;;  %v287_v14 = vsel %vm281_vm4, %v284_v21, %v286_v22 }
  0xb5   : > { %v295_v46 = vsel %vm281_vm4, %v292_v40, %v294_v44  ;;  %v321_v51 = vand.u32 65535, %v291_v45  ;;  %v322_v52 = vshrl.u32 %v291_v45, 16  ;;  %v341_v29 = vmul.u32 %v1112_v38, %v287_v14  ;;  %v560_v14 = vld [vmem:[%s1080_s22 + $0x18] sm:$0xff] }
  0xb6   : > { %v299_v49 = vand.u32 65535, %v295_v46  ;;  %v300_v50 = vshrl.u32 %v295_v46, 16  ;;  %vm391_vm4 = vweird.f32 %v1095_v5 }
  0xb7   : > { %v324_v55 = vmul.u32 %v322_v52, %v297_v47  ;;  %v325_v56 = vmul.u32 %v321_v51, %v298_v48  ;;  %v323_v60 = vmul.u32 %v321_v51, %v297_v47  ;;  %v326_v1 = vmul.u32 %v322_v52, %v298_v48 }
  0xb8   : > { %v302_v53 = vmul.u32 %v300_v50, %v297_v47  ;;  %v303_v54 = vmul.u32 %v299_v49, %v298_v48  ;;  %v301_v57 = vmul.u32 %v299_v49, %v297_v47  ;;  %v304_v59 = vmul.u32 %v300_v50, %v298_v48 }
  0xb9   : > { %v327_v61 = vshll.u32 %v324_v55, 16  ;;  %v329_v3 = vshll.u32 %v325_v56, 16  ;;  %v328_v19 = vshrl.u32 %v324_v55, 16  ;;  %v330_v25 = vshrl.u32 %v325_v56, 16 }
  0xba   : > { %v305_v58 = vshll.u32 %v302_v53, 16  ;;  %v307_v62 = vshll.u32 %v303_v54, 16  ;;  %v306_v13 = vshrl.u32 %v302_v53, 16  ;;  %v308_v23 = vshrl.u32 %v303_v54, 16 }
  0xbb   : > { %vm331_vm6 = vc.u32 %v323_v60, %v327_v61  ;;  %v333_v4 = vadd.s32 %v327_v61, %v323_v60 }
  0xbc   : > { %vm309_vm5 = vc.u32 %v301_v57, %v305_v58  ;;  %v311_v63 = vadd.s32 %v305_v58, %v301_v57  ;;  %v332_v7 = vsel %vm331_vm6, 1, %v969_v0  ;;  %vm630_vm6 = vcmask 261120  }
  0xbd   : > { %v310_v2 = vsel %vm309_vm5, 1, %v969_v0  ;;  %v334_v11 = vadd.s32 %v332_v7, %v326_v1  ;;  %vm335_vm8 = vc.u32 %v333_v4, %v329_v3  ;;  %v337_v28 = vadd.s32 %v333_v4, %v329_v3 }
  0xbe   : > { %v312_v6 = vadd.s32 %v310_v2, %v304_v59  ;;  %vm313_vm7 = vc.u32 %v311_v63, %v307_v62  ;;  %v336_v18 = vsel %vm335_vm8, 1, %v969_v0  ;;  %vm625_vm5 = vcmask 130048  }
  0xbf   : > { %v314_v10 = vsel %vm313_vm7, 1, %v969_v0  ;;  %v338_v20 = vadd.s32 %v336_v18, %v334_v11 }
  0xc0   : > { %v316_v15 = vadd.s32 %v314_v10, %v312_v6 }
  0xc1   : > { %v339_v26 = vadd.s32 %v338_v20, %v328_v19 }
  0xc2   : > { %v317_v24 = vadd.s32 %v316_v15, %v306_v13 }
  0xc3   : > { %v340_v17 = vadd.s32 %v339_v26, %v330_v25  ;;  %v557_v26 = vld [vmem:[%s1080_s22] sm:$0xff] }
  0xc4   : > { %v318_v27 = vadd.s32 %v317_v24, %v308_v23 }
  0xc5   : > { %v344_v0 = vadd.s32 1, %v340_v17 }
  0xc6   : > { %vm343_vm9 = vc.u32 %v318_v27, %v337_v28  ;;  %v342_v16 = vadd.s32 %v337_v28, %v318_v27 }
  0xc7   : > { %v345_v30 = vsel %vm343_vm9, %v344_v0, %v340_v17  ;;  %v558_v17 = vld [vmem:[%s1080_s22 + $0x8] sm:$0xff] }
  0xc8   : > { %v346_v31 = vadd.s32 %v345_v30, %v341_v29 }
  0xca   : > { %v347_v32 = vadd.s32 536870912, %v346_v31 }
  0xcc   : > { %v348_v33 = vshrl.u32 %v347_v32, 30 }
  0xce   : > { %v349_v35 = vshll.u32 %v348_v33, 30  ;;  %v372_v54 = vsub.s32 4, %v348_v33 }
  0xd0   : > { %v350_v34 = vsub.s32 %v346_v31, %v349_v35  ;;  %v373_v59 = vsel %vm250_vm12, %v372_v54, %v348_v33 }
  0xd1   : > { %v375_v62 = vsel %vm249_vm13, 0, %v373_v59 }
  0xd2   : > { %vm351_vm10 = vcmp.lt.s32.totalorder %v350_v34, 0  ;;  %v352_v36 = vsub.s32 0, %v350_v34  ;;  %v546_v4 = vadd.s32 3, %v375_v62  ;;  %v392_v10 = vand.u32 3, %v375_v62 }
  0xd4   : > { %v353_v37 = vsel %vm351_vm10, %v352_v36, %v350_v34  ;;  %v547_v11 = vand.u32 3, %v546_v4  ;;  %vm393_vm14 = vcmp.lt.s32.totalorder %v392_v10, 2  ;;  %vm394_vm15 = vcmp.eq.s32.totalorder %v392_v10, 0 }
  0xd5   : > { %v354_v39 = vclz %v353_v37  ;;  %vm397_vm3 = vcmp.eq.s32.totalorder %v392_v10, 2 }
  0xd6   : > { %vm548_vm0 = vcmp.lt.s32.totalorder %v547_v11, 2  ;;  %vm549_vm1 = vcmp.eq.s32.totalorder %v547_v11, 0  ;;  %vm552_vm2 = vcmp.eq.s32.totalorder %v547_v11, 2 }
  0xd7   : > { %v764_v40 = vadd.s32 4294967294, %v354_v39 }
  0xd9   : > { %vm765_vm11 = vcmp.lt.s32.totalorder %v764_v40, 0 }
  0xda   : > { %v357_v41 = vsel %vm765_vm11, 0, %v764_v40 }
  0xdb   : > { %v358_v42 = vsub.s32 32, %v357_v41  ;;  %v362_v43 = vsub.s32 4294967266, %v357_v41  ;;  %v359_v44 = vshll.u32 %v350_v34, %v357_v41 }
  0xdd   : > { %v360_v45 = vshrl.u32 %v342_v16, %v358_v42  ;;  %v363_v46 = vadd.s32 127, %v362_v43 }
  0xdf   : > { %v361_v38 = vor.u32 %v360_v45, %v359_v44  ;;  %v364_v47 = vshll.u32 %v363_v46, 23 }
  0xe1   : > { %v365_v48 = vor.u32 4788187, %v364_v47  ;;  %v368_v50 = vcvt.s32.f32 %v361_v38 }
  0xe3   : > { %v366_v49 = vand.u32 2147483647, %v365_v48 }
  0xe5   : > { %v369_v51 = vmul.f32 %v368_v50, %v366_v49 }
  0xe7   : > { %v370_v52 = vxor.u32 2147483648, %v369_v51 }
  0xe9   : > { %v371_v53 = vsel %vm250_vm12, %v370_v52, %v369_v51 }
  0xea   : > { %v374_v55 = vsel %vm249_vm13, %v1095_v5, %v371_v53  ;;  %v559_v5 = vld [vmem:[%s1080_s22 + $0x10] sm:$0xff]  ;;  %s649_s22 = sshll.u32 %s228_s9, 4  ;;  %s1169_s22 = int_to_ptr.vmem [resolvable:$true] %s649_s22 }
  0xeb   : > { %v376_v56 = vmul.f32 %v374_v55, %v374_v55 }
  0xed   : > { %v377_v57 = vmul.f32 -0.001358992, %v376_v56  ;;  %v384_v58 = vmul.f32 -0.00019511016, %v376_v56 }
  0xef   : > { %v378_v60 = vadd.f32 0.041655596, %v377_v57  ;;  %v385_v61 = vadd.f32 0.008332121, %v384_v58 }
  0xf1   : > { %v379_v63 = vmul.f32 %v378_v60, %v376_v56  ;;  %v386_v1 = vmul.f32 %v385_v61, %v376_v56 }
  0xf3   : > { %v380_v2 = vadd.f32 -0.4999988, %v379_v63  ;;  %v387_v3 = vadd.f32 -0.16666654, %v386_v1 }
  0xf5   : > { %v381_v6 = vmul.f32 %v380_v2, %v376_v56  ;;  %v388_v7 = vmul.f32 %v387_v3, %v376_v56 }
  0xf7   : > { %v382_v8 = vadd.f32 1.0, %v381_v6  ;;  %v389_v9 = vadd.f32 1.0, %v388_v7 }
  0xf9   : > { %v390_v12 = vmul.f32 %v389_v9, %v374_v55  ;;  %v398_v13 = vxor.u32 2147483648, %v382_v8 }
  0xfb   : > { %v395_v15 = vxor.u32 2147483648, %v390_v12  ;;  %v554_v19 = vsel %vm552_vm2, %v398_v13, %v390_v12  ;;  %v399_v21 = vsel %vm397_vm3, %v398_v13, %v390_v12 }
  0xfd   : > { %v551_v18 = vsel %vm549_vm1, %v382_v8, %v395_v15  ;;  %v396_v20 = vsel %vm394_vm15, %v382_v8, %v395_v15 }
  0xfe   : > { %v555_v22 = vsel %vm548_vm0, %v551_v18, %v554_v19  ;;  %v400_v23 = vsel %vm393_vm14, %v396_v20, %v399_v21 }
  0xff   : > { %v556_v24 = vsel %vm391_vm4, nan, %v555_v22  ;;  %v401_v25 = vsel %vm391_vm4, nan, %v400_v23 }
 0x100   : > { %566 = vrot.lane.b32.xlu0 %v556_v24, %s976_s24  ;;  %594 = vrot.lane.b32.xlu1 %v401_v25, %s976_s24  ;;  %v601_v27 = vmul.f32 %v557_v26, %v556_v24  ;;  %v603_v32 = vmul.f32 %v559_v5, %v556_v24  ;;  %v604_v33 = vmul.f32 %v560_v14, %v556_v24 }
 0x101   : > { %v602_v35 = vmul.f32 %v558_v17, %v556_v24  ;;  %v562_v39 = vmul.f32 %v558_v17, %v401_v25  ;;  %v561_v38 = vmul.f32 %v557_v26, %v401_v25  ;;  %v563_v51 = vmul.f32 %v559_v5, %v401_v25 }
 0x102   : > { %v564_v53 = vmul.f32 %v560_v14, %v401_v25 }
 0x108   : > { %609 = vrot.lane.b32.xlu1 %v601_v27, %s976_s24 }
 0x172   : > { %v567_v28 = vpop.permute.xlu0 %566  ;;  %v595_v36 = vpop.permute.xlu1 %594 }
 0x173   : > { %v572_v0 = vmul.f32 %v567_v28, %v560_v14  ;;  %v570_v29 = vmul.f32 %v567_v28, %v558_v17  ;;  %v569_v30 = vmul.f32 %v567_v28, %v557_v26  ;;  %v571_v31 = vmul.f32 %v567_v28, %v559_v5 }
 0x174   : > { %v598_v40 = vmul.f32 %v595_v36, %v558_v17  ;;  %v597_v45 = vmul.f32 %v595_v36, %v557_v26  ;;  %v599_v52 = vmul.f32 %v595_v36, %v559_v5  ;;  %v600_v55 = vmul.f32 %v595_v36, %v560_v14 }
 0x175   : > { %583 = vrot.lane.b32.xlu0 %v572_v0, %s977_s8  ;;  %579 = vrot.lane.b32.xlu2 %v570_v29, %s977_s8 }
 0x176   : > { %577 = vrot.lane.b32.xlu1 %v569_v30, %s977_s8 }
 0x17a   : > { %v610_v16 = vpop.permute.xlu1 %609 }
 0x17b   : > { %v621_v48 = vadd.f32 %v610_v16, %v597_v45 }
 0x17d   : > { %581 = vrot.lane.b32.xlu2 %v571_v31, %s977_s8  ;;  %613 = vrot.lane.b32.xlu0 %v603_v32, %s976_s24 }
 0x17e   : > { %615 = vrot.lane.b32.xlu1 %v604_v33, %s976_s24 }
 0x185   : > { %611 = vrot.lane.b32.xlu2 %v602_v35, %s976_s24 }
 0x1cf   : > { %v580_v34 = vpop.permute.xlu2 %579 }
 0x1d0   : > { %v590_v42 = vsub.f32 %v562_v39, %v580_v34 }
 0x1d7   : > { %v582_v37 = vpop.permute.xlu2 %581 }
 0x1d8   : > { %v591_v56 = vsub.f32 %v563_v51, %v582_v37 }
 0x1df   : > { %v612_v41 = vpop.permute.xlu2 %611 }
 0x1e0   : > { %v622_v43 = vadd.f32 %v612_v41, %v598_v40 }
 0x1e2   : > { %v627_v44 = vsel %vm625_vm5, %v590_v42, %v622_v43 }
 0x1e3   : > { %632 = vst.msk [vmem:[%s228_s9 + $0x8] sm:$0xff] %vm630_vm6, %v627_v44 }
 0x1e7   : > { %v584_v46 = vpop.permute.xlu0 %583 }
 0x1e8   : > { %v578_v47 = vpop.permute.xlu1 %577  ;;  %v592_v59 = vsub.f32 %v564_v53, %v584_v46 }
 0x1e9   : > { %v589_v49 = vsub.f32 %v561_v38, %v578_v47 }
 0x1eb   : > { %v626_v50 = vsel %vm625_vm5, %v589_v49, %v621_v48 }
 0x1ec   : > { %631 = vst.msk [vmem:[%s228_s9] sm:$0xff] %vm630_vm6, %v626_v50 }
 0x1ef   : > { %v614_v54 = vpop.permute.xlu0 %613 }
 0x1f0   : > { %v623_v57 = vadd.f32 %v614_v54, %v599_v52  ;;  %v616_v58 = vpop.permute.xlu1 %615 }
 0x1f1   : > { %v624_v60 = vadd.f32 %v616_v58, %v600_v55 }
 0x1f2   : > { %v628_v61 = vsel %vm625_vm5, %v591_v56, %v623_v57 }
 0x1f3   : > { %633 = vst.msk [vmem:[%s228_s9 + $0x10] sm:$0xff] %vm630_vm6, %v628_v61  ;;  %v629_v62 = vsel %vm625_vm5, %v592_v59, %v624_v60 }
 0x1f4   : > { %634 = vst.msk [vmem:[%s228_s9 + $0x18] sm:$0xff] %vm630_vm6, %v629_v62 }
 0x1f5   : > { %910 = shalt.err (!%p907_p0)
}
 0x1f6   : > { %s978_s19 = smov 128   ;;  %s979_s24 = smov 8  }
 0x1f7   : > { %778 = dma.vmem_to_hbm [thread:$0]  (%p1051_p9), %s1169_s22, 512, %s652_s21, %s636_s15, %s978_s19, %s978_s19, %s979_s24  }
 0x1f8 PF: > { %s666_s8 = sand.u32 1, %s945_s12   ;;  %p785_p1 = pnand %p755_p12, %p1058_p11 }
 0x1f9   : > { %s667_s9 = scalar_lea.sflag [#allocation4], %s666_s8 }
 0x1fa   : > { %p786_p2 = pneg %p785_p1 }
 0x1fc   : > { %940 = dma.done.wait (%p786_p2), %s667_s9, 512  }
 0x1fd   : > { %942 = vsyncadd (%p786_p2), %s667_s9, 4294966784  ;;  %s19_s17 = sadd.s32 1, %s965_s17   ;;  %s1218_s12 = smov %s949_s13 }
 0x1fe   : > { %p16_p3 = scmp.ge.s32.totalorder %s19_s17, 4   ;;  %s1219_s13 = smov %s953_s14 }
 0x1ff   : > { %s1220_s14 = smov %s1056_s26  ;;  %s1221_s15 = smov %s961_s16 }
 0x200   : > { %s1222_s16 = smov %s1224_s20  ;;  %18 = sbr.rel (!%p16_p3) target bundleno = 6 (0x6), region = 80 }
 0x205   :  { %673 = vsyncpa [#allocation3], 1 }
 0x206   :  { %675 = vsyncpa [#allocation3 + $0x1], 1 }
 0x207   :  { %676 = vsyncpa [#allocation4], 1 }
 0x208   :  { %678 = vsyncpa [#allocation4 + $0x1], 1 }

</bundles_post_ra>
